<compile_context>
chip_gen: v7x
topology: tpu7x:2x2x1
jax: 0.10.0
libtpu: 0.0.40
codegen_flags: <defaults>
</compile_context>

<pallas_src>
import functools

import numpy as np
import jax
import jax.numpy as jnp
from jax import lax
from jax.experimental import pallas as pl
from jax.experimental.pallas import tpu as pltpu


def _round_up(x, m):
    return ((x + m - 1) // m) * m


def _num_tensorcores_per_chip():
    """2 on v7x (two TensorCores share a chip), else 1.  Best-effort heuristic."""
    try:
        kind = jax.devices()[0].device_kind.lower()
    except Exception:
        return 1
    return 2 if "v7" in kind else 1


def _neg_loss_kernel(keys_ref, qT_ref, corr_ref, loss_ref, denom_acc, *, inv_tau):
    k_step = pl.program_id(1)

    @pl.when(k_step == 0)
    def _():
        denom_acc[...] = jnp.zeros_like(denom_acc)

    # (TK, TM) tile of cos/tau: keys on sublanes, queries on lanes (1/tau folded into qT).
    sim = jnp.dot(keys_ref[...], qT_ref[...], preferred_element_type=jnp.float32)

    # Stabilized exp: cos <= 1  =>  sim - 1/tau <= ~0, so no overflow for small tau.
    denom_acc[...] += jnp.sum(jnp.exp(sim - inv_tau), axis=0, keepdims=True)

    @pl.when(k_step == pl.num_programs(1) - 1)
    def _():
        # corr removes the diagonal (self) term and the all-zero padded key rows
        # (each padded row contributes exactly exp(-1/tau)).
        denom = jnp.maximum(denom_acc[...] - corr_ref[...], 1e-30)
        loss_ref[...] = jnp.log(denom) + inv_tau          # undo the stabilization shift


def supervised_neg_loss(f, f_neg, labels, *, temperature=1.0, reduction="mean",
                        block_q=512, block_k=2048, compute_dtype=jnp.bfloat16):
    """Pallas TPU implementation of SupervisedNegLoss.forward (batch_size = f.shape[0])."""
    B, D = f.shape
    N = f_neg.shape[0]
    K = B + N
    inv_tau = 1.0 / float(temperature)
    eps = 1e-8  # matches torch cosine_similarity eps

    f = f.astype(jnp.float32)
    f_neg = f_neg.astype(jnp.float32)
    labels = labels.astype(jnp.int32)

    # ---- wrapper-side precompute: O((B+N)*D), all f32 -------------------------------------
    feats = jnp.concatenate([f, f_neg], axis=0)                              # (K, D)
    inv_norm = lax.rsqrt(jnp.maximum(jnp.sum(feats * feats, axis=1, keepdims=True), eps * eps))
    feats_n = feats * inv_norm                                               # == x / max(|x|,eps)
    q_n = feats_n[:B]

    # Positive-pair statistics per query via per-class segment sums (no (B,B) mask anywhere).
    dense_ids = jnp.searchsorted(jnp.sort(labels), labels)                   # label -> id in [0,B)
    class_sum = jax.ops.segment_sum(q_n, dense_ids, num_segments=B)          # (B, D)
    class_cnt = jax.ops.segment_sum(jnp.ones((B,), jnp.float32), dense_ids, num_segments=B)
    self_cos = jnp.sum(q_n * q_n, axis=1)                                    # 1 except zero rows
    pos_sum = inv_tau * (jnp.sum(q_n * class_sum[dense_ids], axis=1) - self_cos)
    # Rows with no same-label partner give 0/0 -> NaN, matching the PyTorch mean-of-empty.
    mean_pos = pos_sum / (class_cnt[dense_ids] - 1.0)

    # ---- tile sizes, padding, VMEM budget ---------------------------------------------------
    D_pad = _round_up(D, 128)
    TM = min(_round_up(block_q, 128), _round_up(B, 128))    # query tile (lane dim, 128-aligned)
    TK = min(_round_up(block_k, 16), _round_up(K, 16))      # key tile (sublane dim, bf16 safe)

    # v7x (2 TensorCores): ensure the "parallel" query axis has >= 2 tiles so both cores work.
    if _num_tensorcores_per_chip() >= 2:
        b_full = _round_up(B, 128)
        if b_full >= 256 and TM >= b_full:
            TM = _round_up(b_full // 2, 128)

    in_bytes = jnp.dtype(compute_dtype).itemsize

    def vmem_est(tk, tm):
        return (2 * (tk * D_pad + D_pad * tm) * in_bytes    # double-buffered key / qT tiles
                + 3 * tk * tm * 4                           # f32 sim + exp temporaries
                + 16 * tm * 4)                              # corr / out / scratch rows

    VMEM_BUDGET = 40 * 1024 * 1024       # fits v7x's 64 MiB physical VMEM with headroom
    while vmem_est(TK, TM) > VMEM_BUDGET and TK > 64:
        TK = max(64, _round_up(TK // 2, 16))
    while vmem_est(TK, TM) > VMEM_BUDGET and TM > 128:
        TM = max(128, _round_up(TM // 2, 128))

    B_pad = _round_up(B, TM)
    K_pad = _round_up(K, TK)
    n_pad_keys = K_pad - K

    # Keys: normalized [f ; f_neg], zero-padded rows (contribution corrected analytically).
    keys = jnp.zeros((K_pad, D_pad), jnp.float32).at[:K, :D].set(feats_n)
    # Queries transposed to (D_pad, B_pad) with 1/tau folded in: plain NN matmul, lane-dense out.
    qT = jnp.zeros((D_pad, B_pad), jnp.float32).at[:D, :B].set((q_n * inv_tau).T)

    keys_c = keys.astype(compute_dtype)
    qT_c = qT.astype(compute_dtype)

    # Per-query denominator correction: exp(self_sim - 1/tau) (self/diagonal term, computed from
    # the *cast* operands so it tracks the MXU diagonal) + n_pad * exp(-1/tau) (padded key rows).
    q_cast = (q_n * inv_tau).astype(compute_dtype).astype(jnp.float32)
    k_cast = q_n.astype(compute_dtype).astype(jnp.float32)
    self_sim_cast = jnp.sum(q_cast * k_cast, axis=1)
    corr_vals = jnp.exp(self_sim_cast - inv_tau) + n_pad_keys * jnp.exp(jnp.float32(-inv_tau))
    corr = jnp.zeros((1, B_pad), jnp.float32).at[0, :B].set(corr_vals)

    grid = (B_pad // TM, K_pad // TK)
    kernel = functools.partial(_neg_loss_kernel, inv_tau=inv_tau)
    vmem_limit = int(min(48 * 1024 * 1024,
                         max(32 * 1024 * 1024, vmem_est(TK, TM) + 8 * 1024 * 1024)))

    out = pl.pallas_call(
        kernel,
        out_shape=jax.ShapeDtypeStruct((1, B_pad), jnp.float32),
        grid_spec=pltpu.PrefetchScalarGridSpec(
            num_scalar_prefetch=0,
            grid=grid,
            in_specs=[
                pl.BlockSpec((TK, D_pad), lambda i, k: (k, 0)),   # key tile
                pl.BlockSpec((D_pad, TM), lambda i, k: (0, i)),   # query^T tile (resident over k)
                pl.BlockSpec((1, TM), lambda i, k: (0, i)),       # denominator correction row
            ],
            out_specs=pl.BlockSpec((1, TM), lambda i, k: (0, i)),  # lane-dense per-row log-denoms
            scratch_shapes=[
                pltpu.VMEM((1, TM), jnp.float32),                  # running sum of exp
            ],
        ),
        compiler_params=pltpu.CompilerParams(
            dimension_semantics=("parallel", "arbitrary"),
            vmem_limit_bytes=vmem_limit,
        ),
    )(keys_c, qT_c, corr)

    per_row = out[0, :B] - mean_pos
    if reduction == "mean":
        return jnp.mean(per_row)
    elif reduction == "sum":
        return jnp.sum(per_row)
    else:
        raise ValueError("Invalid reduction: {}".format(reduction))


def _reference_loss(f, f_neg, labels, tau=1.0, reduction="mean"):
    """Pure-numpy replica of the PyTorch per-sample loop (for validation)."""
    f = np.asarray(f, np.float64)
    f_neg = np.asarray(f_neg, np.float64)
    labels = np.asarray(labels)
    eps = 1e-8

    def cos(a, b):  # a: (1, D), b: (M, D)
        na = np.maximum(np.linalg.norm(a, axis=1), eps)
        nb = np.maximum(np.linalg.norm(b, axis=1), eps)
        return (b @ a[0]) / (na * nb)

    B = f.shape[0]
    total = 0.0
    for i in range(B):
        single = f[i:i + 1]
        rest_f = np.concatenate([f[:i], f[i + 1:]], axis=0)
        rest_lab = np.concatenate([labels[:i], labels[i + 1:]], axis=0)
        pos_mask = rest_lab == labels[i]
        pos = rest_f[pos_mask]
        neg = np.concatenate([rest_f[~pos_mask], f_neg], axis=0)
        sp = cos(single, pos) / tau
        sn = cos(single, neg) / tau
        denom = np.sum(np.exp(sp)) + np.sum(np.exp(sn))
        total += np.mean(-np.log(np.exp(sp) / denom))
    return total / B if reduction == "mean" else total


if __name__ == "__main__":
    key = jax.random.PRNGKey(0)
    kf, kn, kn2, kf3, kn3 = jax.random.split(key, 5)

    # --- Test 1: small shapes, f32 MXU operands, mean reduction (tight check) ---
    B, D, N_NEG = 8, 32, 8
    f = jax.random.normal(kf, (B, D), dtype=jnp.float32)
    f_neg = jax.random.normal(kn, (N_NEG, D), dtype=jnp.float32)
    labels = jnp.array([0, 1, 0, 1, 2, 2, 0, 1], dtype=jnp.int32)

    loss1 = jax.block_until_ready(
        supervised_neg_loss(f, f_neg, labels, temperature=1.0, reduction="mean",
                            compute_dtype=jnp.float32))
    ref1 = _reference_loss(np.asarray(f), np.asarray(f_neg), np.asarray(labels),
                           tau=1.0, reduction="mean")
    assert np.allclose(float(loss1), ref1, rtol=1e-4, atol=1e-4), (float(loss1), ref1)

    # --- Test 2: bf16 MXU operands, sum reduction, small tau, padded keys + multi key-step ---
    f_neg2 = jax.random.normal(kn2, (13, D), dtype=jnp.float32)
    loss2 = jax.block_until_ready(
        supervised_neg_loss(f, f_neg2, labels, temperature=0.25, reduction="sum",
                            block_k=16, compute_dtype=jnp.bfloat16))
    ref2 = _reference_loss(np.asarray(f), np.asarray(f_neg2), np.asarray(labels),
                           tau=0.25, reduction="sum")
    assert np.allclose(float(loss2), ref2, rtol=3e-2, atol=3e-2), (float(loss2), ref2)

    # --- Test 3: multiple query row-tiles and key tiles, f32, mean reduction ---
    B3, D3, N3 = 200, 48, 16
    f3 = jax.random.normal(kf3, (B3, D3), dtype=jnp.float32)
    f_neg3 = jax.random.normal(kn3, (N3, D3), dtype=jnp.float32)
    labels3 = (jnp.arange(B3) % 5).astype(jnp.int32)
    loss3 = jax.block_until_ready(
        supervised_neg_loss(f3, f_neg3, labels3, temperature=0.5, reduction="mean",
                            block_q=128, block_k=64, compute_dtype=jnp.float32))
    ref3 = _reference_loss(np.asarray(f3), np.asarray(f_neg3), np.asarray(labels3),
                           tau=0.5, reduction="mean")
    assert np.allclose(float(loss3), ref3, rtol=1e-4, atol=1e-4), (float(loss3), ref3)

    # --- Test 4: default (large) tiles, bf16 path, exercises the VMEM-budget tile selection ---
    loss4 = jax.block_until_ready(
        supervised_neg_loss(f3, f_neg3, labels3, temperature=0.5, reduction="mean",
                            compute_dtype=jnp.bfloat16))
    assert np.allclose(float(loss4), ref3, rtol=3e-2, atol=3e-2), (float(loss4), ref3)

    print("KERNEL_OK")
</pallas_src>

<mosaic_0001>
module attributes {stable_mosaic.version = 11 : i64} {
  func.func @_neg_loss_kernel(%arg0: i32, %arg1: i32, %arg2: memref<16x128xf32, #tpu.memory_space<vmem>>, %arg3: memref<128x128xf32, #tpu.memory_space<vmem>>, %arg4: memref<1x128xf32, #tpu.memory_space<vmem>>, %arg5: memref<1x128xf32, #tpu.memory_space<vmem>>, %arg6: memref<1x128xf32, #tpu.memory_space<vmem>>) attributes {dimension_semantics = [#tpu.dimension_semantics<parallel>, #tpu.dimension_semantics<arbitrary>], iteration_bounds = array<i64: 1, 1>, scalar_prefetch = 0 : i64, scratch_operands = 1 : i64, tpu.core_type = #tpu.core_type<tc>, window_params = [{transform_indices = @transform_0, window_bounds = array<i64: 16, 128>}, {transform_indices = @transform_1, window_bounds = array<i64: 128, 128>}, {transform_indices = @transform_2, window_bounds = array<i64: 1, 128>}, {transform_indices = @transform_3, window_bounds = array<i64: 1, 128>}]} {
    %c0_i32 = arith.constant 0 : i32
    %0 = arith.cmpi eq, %arg1, %c0_i32 : i32
    %1 = arith.extui %0 : i1 to i32
    %c0_i32_0 = arith.constant 0 : i32
    %2 = arith.cmpi ne, %1, %c0_i32_0 : i32
    scf.if %2 {
      %cst_12 = arith.constant 0.000000e+00 : f32
      %17 = vector.broadcast %cst_12 : f32 to vector<1x128xf32>
      %c0_13 = arith.constant 0 : index
      %c0_14 = arith.constant 0 : index
      %18 = vector.load %arg6[%c0_13, %c0_14] : memref<1x128xf32, #tpu.memory_space<vmem>>, vector<1x128xf32>
      tpu.vector_store %arg6[%c0_13, %c0_14], %17 {strides = array<i32>} : memref<1x128xf32, #tpu.memory_space<vmem>>, vector<1x128xf32>,
    } else {
    }
    %c0 = arith.constant 0 : index
    %c0_1 = arith.constant 0 : index
    %3 = vector.load %arg2[%c0, %c0_1] : memref<16x128xf32, #tpu.memory_space<vmem>>, vector<16x128xf32>
    %c0_2 = arith.constant 0 : index
    %c0_3 = arith.constant 0 : index
    %4 = vector.load %arg3[%c0_2, %c0_3] : memref<128x128xf32, #tpu.memory_space<vmem>>, vector<128x128xf32>
    %cst = arith.constant dense<0.000000e+00> : vector<16x128xf32>
    %5 = tpu.matmul %3, %4, %cst {dimension_numbers = #tpu.dot_dimension_numbers<[1], [0], [0], [1], [0, 0, 1, 1], [], []>} : vector<16x128xf32>, vector<128x128xf32>, vector<16x128xf32> -> vector<16x128xf32>
    %c0_4 = arith.constant 0 : index
    %c0_5 = arith.constant 0 : index
    %6 = vector.load %arg6[%c0_4, %c0_5] : memref<1x128xf32, #tpu.memory_space<vmem>>, vector<1x128xf32>
    %cst_6 = arith.constant 1.000000e+00 : f32
    %7 = vector.broadcast %cst_6 : f32 to vector<16x128xf32>
    %8 = arith.subf %5, %7 : vector<16x128xf32>
    %9 = math.exp %8 : vector<16x128xf32>
    %cst_7 = arith.constant dense<0.000000e+00> : vector<128xf32>
    %10 = vector.multi_reduction <add>, %9, %cst_7 [0] : vector<16x128xf32> to vector<128xf32>
    %11 = vector.shape_cast %10 : vector<128xf32> to vector<1x128xf32>
    %12 = arith.addf %6, %11 : vector<1x128xf32>
    %c0_8 = arith.constant 0 : index
    %c0_9 = arith.constant 0 : index
    %13 = vector.load %arg6[%c0_8, %c0_9] : memref<1x128xf32, #tpu.memory_space<vmem>>, vector<1x128xf32>
    tpu.vector_store %arg6[%c0_8, %c0_9], %12 {strides = array<i32>} : memref<1x128xf32, #tpu.memory_space<vmem>>, vector<1x128xf32>,
    %c0_i32_10 = arith.constant 0 : i32
    %14 = arith.cmpi eq, %arg1, %c0_i32_10 : i32
    %15 = arith.extui %14 : i1 to i32
    %c0_i32_11 = arith.constant 0 : i32
    %16 = arith.cmpi ne, %15, %c0_i32_11 : i32
    scf.if %16 {
      %c0_12 = arith.constant 0 : index
      %c0_13 = arith.constant 0 : index
      %17 = vector.load %arg6[%c0_12, %c0_13] : memref<1x128xf32, #tpu.memory_space<vmem>>, vector<1x128xf32>
      %c0_14 = arith.constant 0 : index
      %c0_15 = arith.constant 0 : index
      %18 = vector.load %arg4[%c0_14, %c0_15] : memref<1x128xf32, #tpu.memory_space<vmem>>, vector<1x128xf32>
      %19 = arith.subf %17, %18 : vector<1x128xf32>
      %cst_16 = arith.constant 1.000000e-30 : f32
      %20 = vector.broadcast %cst_16 : f32 to vector<1x128xf32>
      %21 = arith.maximumf %19, %20 : vector<1x128xf32>
      %22 = math.log %21 : vector<1x128xf32>
      %cst_17 = arith.constant 1.000000e+00 : f32
      %23 = vector.broadcast %cst_17 : f32 to vector<1x128xf32>
      %24 = arith.addf %22, %23 : vector<1x128xf32>
      %c0_18 = arith.constant 0 : index
      %c0_19 = arith.constant 0 : index
      %25 = vector.load %arg5[%c0_18, %c0_19] : memref<1x128xf32, #tpu.memory_space<vmem>>, vector<1x128xf32>
      tpu.vector_store %arg5[%c0_18, %c0_19], %24 {strides = array<i32>} : memref<1x128xf32, #tpu.memory_space<vmem>>, vector<1x128xf32>,
    } else {
    }
    return
  }
  func.func @transform_0(%arg0: i32, %arg1: i32) -> (i32, i32) {
    %c0_i32 = arith.constant 0 : i32
    %c0_i32_0 = arith.constant 0 : i32
    return %arg1, %c0_i32 : i32, i32
  }
  func.func @transform_1(%arg0: i32, %arg1: i32) -> (i32, i32) {
    %c0_i32 = arith.constant 0 : i32
    %c0_i32_0 = arith.constant 0 : i32
    return %c0_i32, %arg0 : i32, i32
  }
  func.func @transform_2(%arg0: i32, %arg1: i32) -> (i32, i32) {
    %c0_i32 = arith.constant 0 : i32
    %c0_i32_0 = arith.constant 0 : i32
    return %c0_i32, %arg0 : i32, i32
  }
  func.func @transform_3(%arg0: i32, %arg1: i32) -> (i32, i32) {
    %c0_i32 = arith.constant 0 : i32
    %c0_i32_0 = arith.constant 0 : i32
    return %c0_i32, %arg0 : i32, i32
  }
}

</mosaic_0001>

<bundles_post_ra>
// kernel: tpu_custom_call.1
= control target key start
LH: loop header
LB: loop body
LE: loop exit
PB: predicated region body
PF: predicated region fallthrough
CT: control target
= control target key end

     0   :  { %8 = vsyncpa [#allocation4], 0  ;;  %s420_s0 = inlined_call_operand.hbm [shape: f32[16,128], index: 0, kind: input, shape index: {}]   ;;  %s421_s1 = inlined_call_operand.hbm [shape: f32[128,128], index: 1, kind: input, shape index: {}]   ;;  %s422_s2 = inlined_call_operand.vmem [shape: f32[1,128], index: 2, kind: input, shape index: {}]   ;;  %s423_s3 = inlined_call_operand.hbm [shape: f32[1,128], index: 3, kind: output, shape index: {}]  }
   0x1   :  { %9 = vsyncpa [#allocation7], 0 }
   0x2   :  { %10 = vsyncpa [#allocation5], 0  ;;  %s355_s12 = smov [#allocation3]   ;;  %s283_s16 = scalar_lea.hbm %s420_s0, 256 }
   0x3   :  { %s16_s13 = sshll.u32 %s355_s12, 4  ;;  %p284_p0 = scmp.ne.s32.totalorder %s420_s0, %s283_s16  ;;  %s17_s13 = int_to_ptr.vmem [resolvable:$true] %s16_s13 }
   0x4   :  { %p287_p1 = scmp.lt.u32.totalorder %s283_s16, %s420_s0 }
   0x6   :  { %p289_p2 = pnand %p287_p1, %p284_p0 }
   0x8   :  { %292 = shalt.err (!%p289_p2)
}
   0x9   :  { %s293_s21 = scalar_lea.vmem %s17_s13, 256  ;;  %p298_p4 = scmp.lt.s32.totalorder %s17_s13, %s17_s13 }
   0xa   :  { %p294_p3 = scmp.ne.s32.totalorder %s17_s13, %s293_s21  ;;  %p299_p5 = scmp.lt.s32.totalorder %s293_s21, %s293_s21 }
   0xc   :  { %p300_p6 = por %p299_p5, %p298_p4 }
   0xe   :  { %p301_p7 = pnand %p300_p6, %p294_p3 }
  0x10   :  { %304 = shalt.err (!%p301_p7)
}
  0x11   :  { %s356_s22 = smov 128   ;;  %s357_s23 = smov 8  }
  0x12   :  { %22 = dma.hbm_to_vmem [thread:$0]  %s420_s0, 256, %s17_s13, [#allocation4], %s356_s22, %s356_s22, %s357_s23  }
  0x13   :  { %s358_s26 = smov [#allocation6]   ;;  %s305_s30 = scalar_lea.hbm %s421_s1, 2048 }
  0x14   :  { %s28_s27 = sshll.u32 %s358_s26, 4  ;;  %p306_p8 = scmp.ne.s32.totalorder %s421_s1, %s305_s30  ;;  %s29_s27 = int_to_ptr.vmem [resolvable:$true] %s28_s27 }
  0x15   :  { %p309_p9 = scmp.lt.u32.totalorder %s305_s30, %s421_s1 }
  0x17   :  { %p311_p10 = pnand %p309_p9, %p306_p8 }
  0x19   :  { %314 = shalt.err (!%p311_p10)
}
  0x1a   :  { %s315_s8 = scalar_lea.vmem %s29_s27, 2048  ;;  %p320_p12 = scmp.lt.s32.totalorder %s29_s27, %s29_s27 }
  0x1b   :  { %p316_p11 = scmp.ne.s32.totalorder %s29_s27, %s315_s8  ;;  %p321_p13 = scmp.lt.s32.totalorder %s315_s8, %s315_s8 }
  0x1d   :  { %p322_p0 = por %p321_p13, %p320_p12 }
  0x1f   :  { %p323_p1 = pnand %p322_p0, %p316_p11 }
  0x21   :  { %326 = shalt.err (!%p323_p1)
}
  0x22   :  { %34 = dma.hbm_to_vmem [thread:$0]  %s421_s1, 2048, %s29_s27, [#allocation7], %s356_s22, %s356_s22, %s357_s23  }
  0x23   :  { %349 = dma.done.wait [#allocation4], 256  }
  0x24   :  { %350 = vsyncadd [#allocation4], 4294967040 }
  0x25   :  { %351 = dma.done.wait [#allocation7], 2048  }
  0x26   :  { %352 = vsyncadd [#allocation7], 4294965248  ;;  %v50_v0 = vld [vmem:[#allocation6] sm:$0xff]  ;;  %v51_v1 = vld [vmem:[#allocation6 + $0x8] sm:$0xff]  ;;  %v359_v26 = vmov 0.0   ;;  %s360_s11 = smov [#allocation8]  }
  0x27   :  { %v52_v2 = vld [vmem:[#allocation6 + $0x10] sm:$0xff]  ;;  %v239_v3 = vpack.c.bf16 %v51_v1, %v50_v0  ;;  %v53_v4 = vld [vmem:[#allocation6 + $0x18] sm:$0xff]  ;;  %v54_v6 = vld [vmem:[#allocation6 + $0x20] sm:$0xff]  ;;  %47 = vst [vmem:[#allocation2] sm:$0x1] %v359_v26  ;;  %s174_s12 = sshll.u32 %s360_s11, 4  ;;  %s175_s12 = int_to_ptr.vmem [resolvable:$true] %s174_s12 }
  0x28   :  { %v243_v5 = vpack.c.bf16 %v53_v4, %v52_v2  ;;  %v55_v7 = vld [vmem:[#allocation6 + $0x28] sm:$0xff]  ;;  %v48_v9 = vld [vmem:[#allocation3] sm:$0xff]  ;;  %v57_v11 = vld [vmem:[#allocation6 + $0x38] sm:$0xff]  ;;  %s327_s13 = scalar_lea.vmem %s175_s12, 16  ;;  %s331_s14 = scalar_lea.vmem %s175_s12, 32 }
  0x29   :  { %240 = vmatprep.subr.bf16.mxu0 %v239_v3  ;;  %v247_v8 = vpack.c.bf16 %v55_v7, %v54_v6  ;;  %v56_v10 = vld [vmem:[#allocation6 + $0x30] sm:$0xff]  ;;  %236 = vmatprep.mubr.f32.mxu0 %v48_v9  ;;  %v58_v13 = vld [vmem:[#allocation6 + $0x40] sm:$0xff]  ;;  %v59_v14 = vld [vmem:[#allocation6 + $0x48] sm:$0xff]  ;;  %p328_p2 = scmp.ne.s32.totalorder %s175_s12, %s327_s13  ;;  %p332_p3 = scmp.lt.s32.totalorder %s175_s12, %s175_s12 }
  0x2a   :  { %242 = vmatpush3.bf16.msra.mxu0 %v239_v3  ;;  %v251_v12 = vpack.c.bf16 %v57_v11, %v56_v10  ;;  %v255_v15 = vpack.c.bf16 %v59_v14, %v58_v13  ;;  %v60_v16 = vld [vmem:[#allocation6 + $0x50] sm:$0xff]  ;;  %v61_v17 = vld [vmem:[#allocation6 + $0x58] sm:$0xff]  ;;  %v62_v19 = vld [vmem:[#allocation6 + $0x60] sm:$0xff]  ;;  %p333_p4 = scmp.lt.s32.totalorder %s331_s14, %s327_s13 }
  0x2b   :  { %244 = vmatprep.subr.bf16.mxu0 %v243_v5  ;;  %v259_v18 = vpack.c.bf16 %v61_v17, %v60_v16  ;;  %v63_v20 = vld [vmem:[#allocation6 + $0x68] sm:$0xff]  ;;  %v64_v22 = vld [vmem:[#allocation6 + $0x70] sm:$0xff]  ;;  %v65_v23 = vld [vmem:[#allocation6 + $0x78] sm:$0xff] }
  0x2c   :  { %v263_v21 = vpack.c.bf16 %v63_v20, %v62_v19  ;;  %v267_v24 = vpack.c.bf16 %v65_v23, %v64_v22  ;;  %v49_v25 = vld [vmem:[#allocation3 + $0x8] sm:$0xff]  ;;  %v161_v44 = vld [vmem:[%s422_s2] sm:$0x1]  ;;  %p334_p5 = por %p333_p4, %p332_p3 }
  0x2e   :  { %246 = vmatpush3.bf16.msra.mxu0 %v243_v5  ;;  %v141_v41 = vld [vmem:[#allocation2] sm:$0x1]  ;;  %p335_p6 = pnand %p334_p5, %p328_p2 }
  0x2f   :  { %248 = vmatprep.subr.bf16.mxu0 %v247_v8 }
  0x32   :  { %250 = vmatpush3.bf16.msra.mxu0 %v247_v8 }
  0x33   :  { %252 = vmatprep.subr.bf16.mxu0 %v251_v12 }
  0x36   :  { %254 = vmatpush3.bf16.msra.mxu0 %v251_v12 }
  0x37   :  { %256 = vmatprep.subr.bf16.mxu0 %v255_v15 }
  0x3a   :  { %258 = vmatpush3.bf16.msra.mxu0 %v255_v15 }
  0x3b   :  { %260 = vmatprep.subr.bf16.mxu0 %v259_v18 }
  0x3e   :  { %262 = vmatpush3.bf16.msra.mxu0 %v259_v18 }
  0x3f   :  { %264 = vmatprep.subr.bf16.mxu0 %v263_v21 }
  0x42   :  { %266 = vmatpush3.bf16.msra.mxu0 %v263_v21 }
  0x43   :  { %268 = vmatprep.subr.bf16.mxu0 %v267_v24 }
  0x46   :  { %270 = vmatpush3.bf16.msra.mxu0 %v267_v24 }
  0x49   :  { %237 = vmatmul.mubr.f32.vlgmr.msra.gmra.mrb[0].mxu0 %v49_v25 }
 0x11c   :  { %v238_v27 = vpop.f32.mrb[0].mxu0 }
 0x11d   :  { %v185_v28 = vadd.f32 -1.0, %v238_v27  ;;  %v132_v29 = vpop.f32.mrb[1].mxu0 }
 0x11e   :  { %v184_v30 = vadd.f32 -1.0, %v132_v29 }
 0x11f   :  { %v146_v31 = vmul.f32 1.442695, %v185_v28 }
 0x120   :  { %v144_v32 = vmul.f32 1.442695, %v184_v30 }
 0x121   :  { %277 = vpow2.f32 %v146_v31 }
 0x122   :  { %279 = vpow2.f32 %v144_v32 }
 0x12b   :  { %v278_v33 = vpop.eup %277 }
 0x12c   :  { %v280_v34 = vpop.eup %279 }
 0x12d   :  { %v148_v35 = vadd.f32 %v280_v34, %v278_v33 }
 0x12f   :  { %v149_v36 = vrot.slane %v148_v35, 4 }
 0x131   :  { %v150_v37 = vadd.f32 %v149_v36, %v148_v35 }
 0x133   :  { %v151_v38 = vrot.slane %v150_v37, 2 }
 0x135   :  { %v152_v39 = vadd.f32 %v151_v38, %v150_v37 }
 0x137   :  { %v153_v40 = vrot.slane %v152_v39, 1 }
 0x139   :  { %v154_v42 = vadd.f32 %v153_v40, %v152_v39 }
 0x13b   :  { %v155_v43 = vadd.f32 %v154_v42, %v141_v41 }
 0x13d   :  { %156 = vst [vmem:[#allocation2] sm:$0x1] %v155_v43 }
 0x144   :  { %v160_v45 = vld [vmem:[#allocation2] sm:$0x1] }
 0x145   :  { %v162_v46 = vsub.f32 %v160_v45, %v161_v44 }
 0x147   :  { %v163_v47 = vmax.f32 %v162_v46, 1e-30 }
 0x149   :  { %281 = vlog2.f32 %v163_v47 }
 0x153   :  { %v282_v48 = vpop.eup %281 }
 0x154   :  { %v165_v49 = vmul.f32 0.6931472, %v282_v48 }
 0x156   :  { %v166_v50 = vadd.f32 1.0, %v165_v49 }
 0x158   :  { %167 = vst [vmem:[#allocation8] sm:$0x1] %v166_v50 }
 0x159   :  { %338 = shalt.err (!%p335_p6)
}
 0x15a   :  { %s339_s16 = scalar_lea.hbm %s423_s3, 16 }
 0x15b   :  { %p340_p7 = scmp.ne.s32.totalorder %s423_s3, %s339_s16  ;;  %p343_p8 = scmp.lt.u32.totalorder %s339_s16, %s423_s3 }
 0x15d   :  { %p345_p9 = pnand %p343_p8, %p340_p7 }
 0x15f   :  { %348 = shalt.err (!%p345_p9)
}
 0x160   :  { %177 = dma.vmem_to_hbm [thread:$0]  %s175_s12, 16, %s423_s3, [#allocation5]  }
 0x161   :  { %353 = dma.done.wait [#allocation5], 16  }
 0x162   :  { %354 = vsyncadd [#allocation5], 4294967280 }
 0x163   :  { %181 = vsyncpa [#allocation4], 1 }
 0x164   :  { %182 = vsyncpa [#allocation7], 1 }
 0x165   :  { %183 = vsyncpa [#allocation5], 1 }

</bundles_post_ra>
